<compile_context>
chip_gen: v5e
topology: v5e:2x2
jax: 0.10.0
libtpu: 0.0.40
codegen_flags: <defaults>
</compile_context>

<pallas_src>
import functools

import jax
import jax.numpy as jnp
from jax.experimental import pallas as pl
from jax.experimental.pallas import tpu as pltpu

CP = 128            # lane-dense padded output-channel width for every conv GEMM
LRELU_SLOPE = 0.2
BN_EPS = 1e-5       # PyTorch BatchNorm2d default


# ---------------------------------------------------------------------------
# Pallas kernels
# ---------------------------------------------------------------------------

def _conv_bias_lrelu_kernel(p_ref, w_ref, b_ref, o_ref):
    """One M-tile: [bm,K]bf16 @ [K,CP]bf16 -> f32, + bias, LeakyReLU(0.2)."""
    acc = jnp.dot(p_ref[...], w_ref[...], preferred_element_type=jnp.float32)
    acc = acc + b_ref[...]
    o_ref[...] = jnp.where(acc >= 0.0, acc, LRELU_SLOPE * acc)


def conv_bias_lrelu(patches, w, b, *, block_m=128):
    M, K = patches.shape
    bm = min(block_m, M)
    assert M % bm == 0
    cost = pl.CostEstimate(
        flops=2 * M * K * CP + 2 * M * CP,
        transcendentals=0,
        bytes_accessed=M * K * 2 + K * CP * 2 + CP * 4 + M * CP * 4)
    return pl.pallas_call(
        _conv_bias_lrelu_kernel,
        out_shape=jax.ShapeDtypeStruct((M, CP), jnp.float32),
        grid=(M // bm,),
        in_specs=[pl.BlockSpec((bm, K), lambda i: (i, 0)),
                  pl.BlockSpec((K, CP), lambda i: (0, 0)),
                  pl.BlockSpec((1, CP), lambda i: (0, 0))],
        out_specs=pl.BlockSpec((bm, CP), lambda i: (i, 0)),
        compiler_params=pltpu.CompilerParams(dimension_semantics=("parallel",)),
        cost_estimate=cost,
    )(patches, w, b)


def _conv_bn_lrelu_kernel(p_ref, w_ref, g_ref, be_ref, o_ref, *, block_m):
    """Conv GEMM tile into the VMEM-resident output; fused BatchNorm (training
    batch stats, biased var, eps=1e-5) + LeakyReLU epilogue at the last step."""
    i = pl.program_id(0)
    r0 = pl.multiple_of(i * block_m, block_m)
    o_ref[pl.ds(r0, block_m), :] = jnp.dot(
        p_ref[...], w_ref[...], preferred_element_type=jnp.float32)

    @pl.when(i == pl.num_programs(0) - 1)
    def _():
        x = o_ref[...]                                     # [M, CP] f32
        inv_m = 1.0 / x.shape[0]
        mean = jnp.sum(x, axis=0, keepdims=True) * inv_m   # single-pass stats
        var = jnp.sum(x * x, axis=0, keepdims=True) * inv_m - mean * mean
        y = (x - mean) * jax.lax.rsqrt(var + BN_EPS) * g_ref[...] + be_ref[...]
        o_ref[...] = jnp.where(y >= 0.0, y, LRELU_SLOPE * y)


def conv_bn_lrelu(patches, w, g, be, *, block_m=64):
    M, K = patches.shape
    bm = min(block_m, M)
    assert M % bm == 0
    kernel = functools.partial(_conv_bn_lrelu_kernel, block_m=bm)
    cost = pl.CostEstimate(
        flops=2 * M * K * CP + 10 * M * CP,
        transcendentals=CP,
        bytes_accessed=M * K * 2 + K * CP * 2 + 2 * CP * 4 + M * CP * 4)
    return pl.pallas_call(
        kernel,
        out_shape=jax.ShapeDtypeStruct((M, CP), jnp.float32),
        grid=(M // bm,),
        in_specs=[pl.BlockSpec((bm, K), lambda i: (i, 0)),
                  pl.BlockSpec((K, CP), lambda i: (0, 0)),
                  pl.BlockSpec((1, CP), lambda i: (0, 0)),
                  pl.BlockSpec((1, CP), lambda i: (0, 0))],
        out_specs=pl.BlockSpec((M, CP), lambda i: (0, 0)),   # resident across grid
        compiler_params=pltpu.CompilerParams(dimension_semantics=("arbitrary",)),
        cost_estimate=cost,
    )(patches, w, g, be)


def _conv_bn_lrelu_head_kernel(p_ref, w_ref, g_ref, be_ref, w4_ref, seg_ref,
                               b4_ref, o4_ref, acc_ref, *, block_m):
    """Layer-3 conv + BN + LeakyReLU (in a VMEM scratch), then the fused final
    4x4/stride-2/pad-0 conv (+bias, sigmoid) as a per-sample contraction."""
    i = pl.program_id(0)
    r0 = pl.multiple_of(i * block_m, block_m)
    acc_ref[pl.ds(r0, block_m), :] = jnp.dot(
        p_ref[...], w_ref[...], preferred_element_type=jnp.float32)

    @pl.when(i == pl.num_programs(0) - 1)
    def _():
        x = acc_ref[...]                                   # [M, CP] f32
        inv_m = 1.0 / x.shape[0]
        mean = jnp.sum(x, axis=0, keepdims=True) * inv_m
        var = jnp.sum(x * x, axis=0, keepdims=True) * inv_m - mean * mean
        y = (x - mean) * jax.lax.rsqrt(var + BN_EPS) * g_ref[...] + be_ref[...]
        y = jnp.where(y >= 0.0, y, LRELU_SLOPE * y)
        # final conv: weight spread per (spatial-row, channel), summed per sample
        prod = y * w4_ref[...]                             # [M, CP]
        per_sample = jnp.dot(seg_ref[...], prod,
                             preferred_element_type=jnp.float32)   # [N, CP]
        logit = jnp.sum(per_sample, axis=1, keepdims=True) + b4_ref[...]
        o4_ref[...] = jax.nn.sigmoid(logit)                # [N, 1]


def conv_bn_lrelu_head(patches, w, g, be, w4t, seg, b4, *, block_m=64):
    M, K = patches.shape
    N = seg.shape[0]
    bm = min(block_m, M)
    assert M % bm == 0
    kernel = functools.partial(_conv_bn_lrelu_head_kernel, block_m=bm)
    cost = pl.CostEstimate(
        flops=2 * M * K * CP + 10 * M * CP + 2 * N * M * CP + 2 * N * CP,
        transcendentals=CP + N,
        bytes_accessed=(M * K * 2 + K * CP * 2 + 2 * CP * 4
                        + M * CP * 4 + N * M * 4 + 2 * N * 4))
    return pl.pallas_call(
        kernel,
        out_shape=jax.ShapeDtypeStruct((N, 1), jnp.float32),
        grid=(M // bm,),
        in_specs=[pl.BlockSpec((bm, K), lambda i: (i, 0)),
                  pl.BlockSpec((K, CP), lambda i: (0, 0)),
                  pl.BlockSpec((1, CP), lambda i: (0, 0)),
                  pl.BlockSpec((1, CP), lambda i: (0, 0)),
                  pl.BlockSpec((M, CP), lambda i: (0, 0)),
                  pl.BlockSpec((N, M), lambda i: (0, 0)),
                  pl.BlockSpec((N, 1), lambda i: (0, 0))],
        out_specs=pl.BlockSpec((N, 1), lambda i: (0, 0)),
        scratch_shapes=[pltpu.VMEM((M, CP), jnp.float32)],
        compiler_params=pltpu.CompilerParams(dimension_semantics=("arbitrary",)),
        cost_estimate=cost,
    )(patches, w, g, be, w4t, seg, b4)


# ---------------------------------------------------------------------------
# Plain-JAX glue: channel-last patch extraction + parameter preparation
# ---------------------------------------------------------------------------

def nhwc_patches(x, kh, kw, stride, pad):
    """NHWC -> GEMM patches [N*OH*OW, KH*KW*C] (kh,kw-major, C-minor), bf16."""
    N, H, W, C = x.shape
    xp = jnp.pad(x, ((0, 0), (pad, pad), (pad, pad), (0, 0)))
    OH = (H + 2 * pad - kh) // stride + 1
    OW = (W + 2 * pad - kw) // stride + 1
    cols = [xp[:, i:i + stride * OH:stride, j:j + stride * OW:stride, :]
            for i in range(kh) for j in range(kw)]
    p = jnp.stack(cols, axis=3)                       # (N, OH, OW, KH*KW, C)
    p = p.reshape(N * OH * OW, kh * kw * C)
    return p.astype(jnp.bfloat16), OH, OW


def conv_weight_to_gemm(w_oihw, cp=CP):
    """OIHW -> [KH*KW*Cin, CP] (kh,kw-major, Cin-minor), zero-padded Cout, bf16."""
    Cout, Cin, KH, KW = w_oihw.shape
    w = jnp.transpose(w_oihw, (2, 3, 1, 0)).reshape(KH * KW * Cin, Cout)
    return jnp.pad(w, ((0, 0), (0, cp - Cout))).astype(jnp.bfloat16)


def pad_lane(v, cp=CP):
    """1-D per-channel vector -> [1, CP] f32 with zero-padded lanes."""
    return jnp.pad(v.astype(jnp.float32)[None, :], ((0, 0), (0, cp - v.shape[0])))


# ---------------------------------------------------------------------------
# Discriminator forward (DCgan branch)
# ---------------------------------------------------------------------------

def discriminator_forward(x_nchw, params, channels):
    c1, c2 = channels
    N = x_nchw.shape[0]
    x = jnp.transpose(x_nchw, (0, 2, 3, 1))           # NCHW -> NHWC, once

    # layer 1: Conv + bias + LeakyReLU
    p, OH, OW = nhwc_patches(x, 4, 4, 2, 1)
    y = conv_bias_lrelu(p, params["w1"], params["b1"], block_m=128)
    x = y.reshape(N, OH, OW, CP)[..., :c1]            # slice valid channels

    # block 2: Conv (no bias) + BatchNorm + LeakyReLU (fused)
    p, OH, OW = nhwc_patches(x, 4, 4, 2, 1)
    y = conv_bn_lrelu(p, params["w2"], params["g2"], params["be2"], block_m=64)
    x = y.reshape(N, OH, OW, CP)[..., :c2]

    # block 3 + final Conv + bias + Sigmoid (all fused in one kernel)
    p, OH, OW = nhwc_patches(x, 4, 4, 2, 1)
    out = conv_bn_lrelu_head(p, params["w3"], params["g3"], params["be3"],
                             params["w4t"], params["seg"], params["b4"],
                             block_m=64)
    return out.reshape(N, 1, 1, 1)

# TODO(synk): Wgan-GP branch (InstanceNorm2d + no sigmoid) and
# calculate_disc_loss (BCELoss / autograd gradient penalty) are not part of
# this forward-pass kernel.


# ---------------------------------------------------------------------------
# Pure-JAX reference (bf16 matmul operands, f32 accumulation — matches kernel)
# ---------------------------------------------------------------------------

def ref_forward(x, raw):
    def conv(x, w, stride, pad, b=None, bf16=True):
        lhs = x.astype(jnp.bfloat16) if bf16 else x
        rhs = w.astype(jnp.bfloat16) if bf16 else w
        out = jax.lax.conv_general_dilated(
            lhs, rhs, (stride, stride), [(pad, pad), (pad, pad)],
            dimension_numbers=("NCHW", "OIHW", "NCHW"),
            preferred_element_type=jnp.float32)
        if b is not None:
            out = out + b[None, :, None, None]
        return out

    def bn_lr(x, g, b):
        mean = jnp.mean(x, axis=(0, 2, 3), keepdims=True)
        var = jnp.mean((x - mean) ** 2, axis=(0, 2, 3), keepdims=True)
        y = (x - mean) / jnp.sqrt(var + BN_EPS) * g[None, :, None, None] \
            + b[None, :, None, None]
        return jnp.where(y >= 0, y, LRELU_SLOPE * y)

    x = conv(x, raw["w1"], 2, 1, raw["b1"])
    x = jnp.where(x >= 0, x, LRELU_SLOPE * x)
    x = bn_lr(conv(x, raw["w2"], 2, 1), raw["g2"], raw["be2"])
    x = bn_lr(conv(x, raw["w3"], 2, 1), raw["g3"], raw["be3"])
    x = conv(x, raw["w4"], 2, 0, raw["b4"], bf16=False)   # head conv is f32 in kernel
    return jax.nn.sigmoid(x)


# ---------------------------------------------------------------------------

if __name__ == "__main__":
    key = jax.random.PRNGKey(0)
    N, Cin, H, W = 2, 3, 32, 32          # Model['num_of_output_channels'] = 3
    F = 8                                # Model['features_multiplyer']    = 8
    ks = jax.random.split(key, 8)

    x = jax.random.normal(ks[0], (N, Cin, H, W), jnp.float32)

    # DCGAN-style N(0, 0.02) conv weights; BatchNorm affine at PyTorch defaults.
    raw = {
        "w1": 0.02 * jax.random.normal(ks[1], (F, Cin, 4, 4), jnp.float32),
        "b1": 0.02 * jax.random.normal(ks[2], (F,), jnp.float32),
        "w2": 0.02 * jax.random.normal(ks[3], (2 * F, F, 4, 4), jnp.float32),
        "g2": jnp.ones((2 * F,), jnp.float32),
        "be2": jnp.zeros((2 * F,), jnp.float32),
        "w3": 0.02 * jax.random.normal(ks[4], (4 * F, 2 * F, 4, 4), jnp.float32),
        "g3": jnp.ones((4 * F,), jnp.float32),
        "be3": jnp.zeros((4 * F,), jnp.float32),
        "w4": 0.02 * jax.random.normal(ks[5], (1, 4 * F, 4, 4), jnp.float32),
        "b4": 0.02 * jax.random.normal(ks[6], (1,), jnp.float32),
    }

    # geometry of the fused head (layer-3 spatial is 4x4 for a 32x32 input)
    s3 = H // 8
    assert s3 == 4, "final 4x4 conv expects a 4x4 layer-3 feature map"
    rps = s3 * s3                                       # rows per sample
    w4_k = jnp.transpose(raw["w4"], (2, 3, 1, 0)).reshape(rps, 4 * F)
    w4t = jnp.tile(jnp.pad(w4_k, ((0, 0), (0, CP - 4 * F))), (N, 1)).astype(jnp.float32)
    seg = jnp.kron(jnp.eye(N, dtype=jnp.float32), jnp.ones((1, rps), jnp.float32))

    params = {
        "w1": conv_weight_to_gemm(raw["w1"]), "b1": pad_lane(raw["b1"]),
        "w2": conv_weight_to_gemm(raw["w2"]),
        "g2": pad_lane(raw["g2"]), "be2": pad_lane(raw["be2"]),
        "w3": conv_weight_to_gemm(raw["w3"]),
        "g3": pad_lane(raw["g3"]), "be3": pad_lane(raw["be3"]),
        "w4t": w4t, "seg": seg,
        "b4": jnp.full((N, 1), raw["b4"][0], jnp.float32),
    }

    fwd = jax.jit(functools.partial(discriminator_forward, channels=(F, 2 * F)))
    out = jax.block_until_ready(fwd(x, params))
    assert out.shape == (N, 1, 1, 1), out.shape

    ref = jax.block_until_ready(ref_forward(x, raw))
    assert jnp.allclose(out, ref, atol=1e-3, rtol=1e-3), (
        f"max err {jnp.max(jnp.abs(out - ref))}")

    print("KERNEL_OK")
</pallas_src>

<mosaic_0001>
module attributes {stable_mosaic.version = 11 : i64} {
  func.func @_conv_bias_lrelu_kernel(%arg0: i32, %arg1: memref<128x48xbf16, #tpu.memory_space<vmem>>, %arg2: memref<48x128xbf16, #tpu.memory_space<vmem>>, %arg3: memref<1x128xf32, #tpu.memory_space<vmem>>, %arg4: memref<128x128xf32, #tpu.memory_space<vmem>>) attributes {dimension_semantics = [#tpu.dimension_semantics<parallel>], iteration_bounds = array<i64: 4>, scalar_prefetch = 0 : i64, scratch_operands = 0 : i64, tpu.core_type = #tpu.core_type<tc>, window_params = [{transform_indices = @transform_0, window_bounds = array<i64: 128, 48>}, {pipeline_mode = #tpu.pipeline_mode<synchronous>, transform_indices = @transform_1, window_bounds = array<i64: 48, 128>}, {pipeline_mode = #tpu.pipeline_mode<synchronous>, transform_indices = @transform_2, window_bounds = array<i64: 1, 128>}, {transform_indices = @transform_3, window_bounds = array<i64: 128, 128>}]} {
    %c0 = arith.constant 0 : index
    %c0_0 = arith.constant 0 : index
    %0 = vector.load %arg1[%c0, %c0_0] : memref<128x48xbf16, #tpu.memory_space<vmem>>, vector<128x48xbf16>
    %c0_1 = arith.constant 0 : index
    %c0_2 = arith.constant 0 : index
    %1 = vector.load %arg2[%c0_1, %c0_2] : memref<48x128xbf16, #tpu.memory_space<vmem>>, vector<48x128xbf16>
    %cst = arith.constant dense<0.000000e+00> : vector<128x128xf32>
    %2 = tpu.matmul %0, %1, %cst {dimension_numbers = #tpu.dot_dimension_numbers<[1], [0], [0], [1], [0, 0, 1, 1], [], []>} : vector<128x48xbf16>, vector<48x128xbf16>, vector<128x128xf32> -> vector<128x128xf32>
    %c0_3 = arith.constant 0 : index
    %c0_4 = arith.constant 0 : index
    %3 = vector.load %arg3[%c0_3, %c0_4] : memref<1x128xf32, #tpu.memory_space<vmem>>, vector<1x128xf32>
    %4 = vector.broadcast %3 : vector<1x128xf32> to vector<128x128xf32>
    %5 = arith.addf %2, %4 : vector<128x128xf32>
    %cst_5 = arith.constant 0.000000e+00 : f32
    %6 = vector.broadcast %cst_5 : f32 to vector<128x128xf32>
    %7 = arith.cmpf oge, %5, %6 : vector<128x128xf32>
    %cst_6 = arith.constant 2.000000e-01 : f32
    %8 = vector.broadcast %cst_6 : f32 to vector<128x128xf32>
    %9 = arith.mulf %8, %5 : vector<128x128xf32>
    %10 = arith.select %7, %5, %9 : vector<128x128xi1>, vector<128x128xf32>
    %c0_7 = arith.constant 0 : index
    %c0_8 = arith.constant 0 : index
    %11 = vector.load %arg4[%c0_7, %c0_8] : memref<128x128xf32, #tpu.memory_space<vmem>>, vector<128x128xf32>
    tpu.vector_store %arg4[%c0_7, %c0_8], %10 {strides = array<i32>} : memref<128x128xf32, #tpu.memory_space<vmem>>, vector<128x128xf32>,
    return
  }
  func.func @transform_0(%arg0: i32) -> (i32, i32) {
    %c0_i32 = arith.constant 0 : i32
    %c0_i32_0 = arith.constant 0 : i32
    return %arg0, %c0_i32 : i32, i32
  }
  func.func @transform_1(%arg0: i32) -> (i32, i32) {
    %c0_i32 = arith.constant 0 : i32
    %c0_i32_0 = arith.constant 0 : i32
    %c0_i32_1 = arith.constant 0 : i32
    return %c0_i32, %c0_i32_0 : i32, i32
  }
  func.func @transform_2(%arg0: i32) -> (i32, i32) {
    %c0_i32 = arith.constant 0 : i32
    %c0_i32_0 = arith.constant 0 : i32
    %c0_i32_1 = arith.constant 0 : i32
    return %c0_i32, %c0_i32_0 : i32, i32
  }
  func.func @transform_3(%arg0: i32) -> (i32, i32) {
    %c0_i32 = arith.constant 0 : i32
    %c0_i32_0 = arith.constant 0 : i32
    return %arg0, %c0_i32 : i32, i32
  }
}

module attributes {stable_mosaic.version = 11 : i64} {
  func.func @_conv_bn_lrelu_kernel(%arg0: i32, %arg1: memref<64x128xbf16, #tpu.memory_space<vmem>>, %arg2: memref<128x128xbf16, #tpu.memory_space<vmem>>, %arg3: memref<1x128xf32, #tpu.memory_space<vmem>>, %arg4: memref<1x128xf32, #tpu.memory_space<vmem>>, %arg5: memref<128x128xf32, #tpu.memory_space<vmem>>) attributes {dimension_semantics = [#tpu.dimension_semantics<arbitrary>], iteration_bounds = array<i64: 2>, scalar_prefetch = 0 : i64, scratch_operands = 0 : i64, tpu.core_type = #tpu.core_type<tc>, window_params = [{transform_indices = @transform_0, window_bounds = array<i64: 64, 128>}, {pipeline_mode = #tpu.pipeline_mode<synchronous>, transform_indices = @transform_1, window_bounds = array<i64: 128, 128>}, {pipeline_mode = #tpu.pipeline_mode<synchronous>, transform_indices = @transform_2, window_bounds = array<i64: 1, 128>}, {pipeline_mode = #tpu.pipeline_mode<synchronous>, transform_indices = @transform_3, window_bounds = array<i64: 1, 128>}, {pipeline_mode = #tpu.pipeline_mode<synchronous>, transform_indices = @transform_4, window_bounds = array<i64: 128, 128>}]} {
    %c64_i32 = arith.constant 64 : i32
    %0 = arith.muli %arg0, %c64_i32 : i32
    %1 = tpu.assume_multiple %0, 64 : i32
    %c0 = arith.constant 0 : index
    %c0_0 = arith.constant 0 : index
    %2 = vector.load %arg1[%c0, %c0_0] : memref<64x128xbf16, #tpu.memory_space<vmem>>, vector<64x128xbf16>
    %c0_1 = arith.constant 0 : index
    %c0_2 = arith.constant 0 : index
    %3 = vector.load %arg2[%c0_1, %c0_2] : memref<128x128xbf16, #tpu.memory_space<vmem>>, vector<128x128xbf16>
    %cst = arith.constant dense<0.000000e+00> : vector<64x128xf32>
    %4 = tpu.matmul %2, %3, %cst {dimension_numbers = #tpu.dot_dimension_numbers<[1], [0], [0], [1], [0, 0, 1, 1], [], []>} : vector<64x128xbf16>, vector<128x128xbf16>, vector<64x128xf32> -> vector<64x128xf32>
    %5 = arith.index_cast %1 : i32 to index
    %c0_3 = arith.constant 0 : index
    %6 = vector.load %arg5[%5, %c0_3] : memref<128x128xf32, #tpu.memory_space<vmem>>, vector<64x128xf32>
    tpu.vector_store %arg5[%5, %c0_3], %4 {strides = array<i32>} : memref<128x128xf32, #tpu.memory_space<vmem>>, vector<64x128xf32>,
    %c1_i32 = arith.constant 1 : i32
    %7 = arith.cmpi eq, %arg0, %c1_i32 : i32
    %8 = arith.extui %7 : i1 to i32
    %c0_i32 = arith.constant 0 : i32
    %9 = arith.cmpi ne, %8, %c0_i32 : i32
    scf.if %9 {
      %c0_4 = arith.constant 0 : index
      %c0_5 = arith.constant 0 : index
      %10 = vector.load %arg5[%c0_4, %c0_5] : memref<128x128xf32, #tpu.memory_space<vmem>>, vector<128x128xf32>
      %cst_6 = arith.constant dense<0.000000e+00> : vector<128xf32>
      %11 = vector.multi_reduction <add>, %10, %cst_6 [0] : vector<128x128xf32> to vector<128xf32>
      %12 = vector.shape_cast %11 : vector<128xf32> to vector<1x128xf32>
      %cst_7 = arith.constant 7.812500e-03 : f32
      %13 = vector.broadcast %cst_7 : f32 to vector<1x128xf32>
      %14 = arith.mulf %12, %13 : vector<1x128xf32>
      %15 = arith.mulf %10, %10 : vector<128x128xf32>
      %cst_8 = arith.constant dense<0.000000e+00> : vector<128xf32>
      %16 = vector.multi_reduction <add>, %15, %cst_8 [0] : vector<128x128xf32> to vector<128xf32>
      %17 = vector.shape_cast %16 : vector<128xf32> to vector<1x128xf32>
      %cst_9 = arith.constant 7.812500e-03 : f32
      %18 = vector.broadcast %cst_9 : f32 to vector<1x128xf32>
      %19 = arith.mulf %17, %18 : vector<1x128xf32>
      %20 = arith.mulf %14, %14 : vector<1x128xf32>
      %21 = arith.subf %19, %20 : vector<1x128xf32>
      %22 = vector.broadcast %14 : vector<1x128xf32> to vector<128x128xf32>
      %23 = arith.subf %10, %22 : vector<128x128xf32>
      %cst_10 = arith.constant 9.99999974E-6 : f32
      %24 = vector.broadcast %cst_10 : f32 to vector<1x128xf32>
      %25 = arith.addf %21, %24 : vector<1x128xf32>
      %26 = math.rsqrt %25 : vector<1x128xf32>
      %27 = vector.broadcast %26 : vector<1x128xf32> to vector<128x128xf32>
      %28 = arith.mulf %23, %27 : vector<128x128xf32>
      %c0_11 = arith.constant 0 : index
      %c0_12 = arith.constant 0 : index
      %29 = vector.load %arg3[%c0_11, %c0_12] : memref<1x128xf32, #tpu.memory_space<vmem>>, vector<1x128xf32>
      %30 = vector.broadcast %29 : vector<1x128xf32> to vector<128x128xf32>
      %31 = arith.mulf %28, %30 : vector<128x128xf32>
      %c0_13 = arith.constant 0 : index
      %c0_14 = arith.constant 0 : index
      %32 = vector.load %arg4[%c0_13, %c0_14] : memref<1x128xf32, #tpu.memory_space<vmem>>, vector<1x128xf32>
      %33 = vector.broadcast %32 : vector<1x128xf32> to vector<128x128xf32>
      %34 = arith.addf %31, %33 : vector<128x128xf32>
      %cst_15 = arith.constant 0.000000e+00 : f32
      %35 = vector.broadcast %cst_15 : f32 to vector<128x128xf32>
      %36 = arith.cmpf oge, %34, %35 : vector<128x128xf32>
      %cst_16 = arith.constant 2.000000e-01 : f32
      %37 = vector.broadcast %cst_16 : f32 to vector<128x128xf32>
      %38 = arith.mulf %37, %34 : vector<128x128xf32>
      %39 = arith.select %36, %34, %38 : vector<128x128xi1>, vector<128x128xf32>
      %c0_17 = arith.constant 0 : index
      %c0_18 = arith.constant 0 : index
      %40 = vector.load %arg5[%c0_17, %c0_18] : memref<128x128xf32, #tpu.memory_space<vmem>>, vector<128x128xf32>
      tpu.vector_store %arg5[%c0_17, %c0_18], %39 {strides = array<i32>} : memref<128x128xf32, #tpu.memory_space<vmem>>, vector<128x128xf32>,
    } else {
    }
    return
  }
  func.func @transform_0(%arg0: i32) -> (i32, i32) {
    %c0_i32 = arith.constant 0 : i32
    %c0_i32_0 = arith.constant 0 : i32
    return %arg0, %c0_i32 : i32, i32
  }
  func.func @transform_1(%arg0: i32) -> (i32, i32) {
    %c0_i32 = arith.constant 0 : i32
    %c0_i32_0 = arith.constant 0 : i32
    %c0_i32_1 = arith.constant 0 : i32
    return %c0_i32, %c0_i32_0 : i32, i32
  }
  func.func @transform_2(%arg0: i32) -> (i32, i32) {
    %c0_i32 = arith.constant 0 : i32
    %c0_i32_0 = arith.constant 0 : i32
    %c0_i32_1 = arith.constant 0 : i32
    return %c0_i32, %c0_i32_0 : i32, i32
  }
  func.func @transform_3(%arg0: i32) -> (i32, i32) {
    %c0_i32 = arith.constant 0 : i32
    %c0_i32_0 = arith.constant 0 : i32
    %c0_i32_1 = arith.constant 0 : i32
    return %c0_i32, %c0_i32_0 : i32, i32
  }
  func.func @transform_4(%arg0: i32) -> (i32, i32) {
    %c0_i32 = arith.constant 0 : i32
    %c0_i32_0 = arith.constant 0 : i32
    %c0_i32_1 = arith.constant 0 : i32
    return %c0_i32, %c0_i32_0 : i32, i32
  }
}

module attributes {stable_mosaic.version = 11 : i64} {
  func.func @_conv_bn_lrelu_head_kernel(%arg0: i32, %arg1: memref<32x256xbf16, #tpu.memory_space<vmem>>, %arg2: memref<256x128xbf16, #tpu.memory_space<vmem>>, %arg3: memref<1x128xf32, #tpu.memory_space<vmem>>, %arg4: memref<1x128xf32, #tpu.memory_space<vmem>>, %arg5: memref<32x128xf32, #tpu.memory_space<vmem>>, %arg6: memref<2x32xf32, #tpu.memory_space<vmem>>, %arg7: memref<2x1xf32, #tpu.memory_space<vmem>>, %arg8: memref<2x1xf32, #tpu.memory_space<vmem>>, %arg9: memref<32x128xf32, #tpu.memory_space<vmem>>) attributes {dimension_semantics = [#tpu.dimension_semantics<arbitrary>], iteration_bounds = array<i64: 1>, scalar_prefetch = 0 : i64, scratch_operands = 1 : i64, tpu.core_type = #tpu.core_type<tc>, window_params = [{transform_indices = @transform_0, window_bounds = array<i64: 32, 256>}, {pipeline_mode = #tpu.pipeline_mode<synchronous>, transform_indices = @transform_1, window_bounds = array<i64: 256, 128>}, {pipeline_mode = #tpu.pipeline_mode<synchronous>, transform_indices = @transform_2, window_bounds = array<i64: 1, 128>}, {pipeline_mode = #tpu.pipeline_mode<synchronous>, transform_indices = @transform_3, window_bounds = array<i64: 1, 128>}, {pipeline_mode = #tpu.pipeline_mode<synchronous>, transform_indices = @transform_4, window_bounds = array<i64: 32, 128>}, {pipeline_mode = #tpu.pipeline_mode<synchronous>, transform_indices = @transform_5, window_bounds = array<i64: 2, 32>}, {pipeline_mode = #tpu.pipeline_mode<synchronous>, transform_indices = @transform_6, window_bounds = array<i64: 2, 1>}, {pipeline_mode = #tpu.pipeline_mode<synchronous>, transform_indices = @transform_7, window_bounds = array<i64: 2, 1>}]} {
    %c32_i32 = arith.constant 32 : i32
    %0 = arith.muli %arg0, %c32_i32 : i32
    %1 = tpu.assume_multiple %0, 32 : i32
    %c0 = arith.constant 0 : index
    %c0_0 = arith.constant 0 : index
    %2 = vector.load %arg1[%c0, %c0_0] : memref<32x256xbf16, #tpu.memory_space<vmem>>, vector<32x256xbf16>
    %c0_1 = arith.constant 0 : index
    %c0_2 = arith.constant 0 : index
    %3 = vector.load %arg2[%c0_1, %c0_2] : memref<256x128xbf16, #tpu.memory_space<vmem>>, vector<256x128xbf16>
    %cst = arith.constant dense<0.000000e+00> : vector<32x128xf32>
    %4 = tpu.matmul %2, %3, %cst {dimension_numbers = #tpu.dot_dimension_numbers<[1], [0], [0], [1], [0, 0, 1, 1], [], []>} : vector<32x256xbf16>, vector<256x128xbf16>, vector<32x128xf32> -> vector<32x128xf32>
    %5 = arith.index_cast %1 : i32 to index
    %c0_3 = arith.constant 0 : index
    %6 = vector.load %arg9[%5, %c0_3] : memref<32x128xf32, #tpu.memory_space<vmem>>, vector<32x128xf32>
    tpu.vector_store %arg9[%5, %c0_3], %4 {strides = array<i32>} : memref<32x128xf32, #tpu.memory_space<vmem>>, vector<32x128xf32>,
    %c0_i32 = arith.constant 0 : i32
    %7 = arith.cmpi eq, %arg0, %c0_i32 : i32
    %8 = arith.extui %7 : i1 to i32
    %c0_i32_4 = arith.constant 0 : i32
    %9 = arith.cmpi ne, %8, %c0_i32_4 : i32
    scf.if %9 {
      %c0_5 = arith.constant 0 : index
      %c0_6 = arith.constant 0 : index
      %10 = vector.load %arg9[%c0_5, %c0_6] : memref<32x128xf32, #tpu.memory_space<vmem>>, vector<32x128xf32>
      %cst_7 = arith.constant dense<0.000000e+00> : vector<128xf32>
      %11 = vector.multi_reduction <add>, %10, %cst_7 [0] : vector<32x128xf32> to vector<128xf32>
      %12 = vector.shape_cast %11 : vector<128xf32> to vector<1x128xf32>
      %cst_8 = arith.constant 3.125000e-02 : f32
      %13 = vector.broadcast %cst_8 : f32 to vector<1x128xf32>
      %14 = arith.mulf %12, %13 : vector<1x128xf32>
      %15 = arith.mulf %10, %10 : vector<32x128xf32>
      %cst_9 = arith.constant dense<0.000000e+00> : vector<128xf32>
      %16 = vector.multi_reduction <add>, %15, %cst_9 [0] : vector<32x128xf32> to vector<128xf32>
      %17 = vector.shape_cast %16 : vector<128xf32> to vector<1x128xf32>
      %cst_10 = arith.constant 3.125000e-02 : f32
      %18 = vector.broadcast %cst_10 : f32 to vector<1x128xf32>
      %19 = arith.mulf %17, %18 : vector<1x128xf32>
      %20 = arith.mulf %14, %14 : vector<1x128xf32>
      %21 = arith.subf %19, %20 : vector<1x128xf32>
      %22 = vector.broadcast %14 : vector<1x128xf32> to vector<32x128xf32>
      %23 = arith.subf %10, %22 : vector<32x128xf32>
      %cst_11 = arith.constant 9.99999974E-6 : f32
      %24 = vector.broadcast %cst_11 : f32 to vector<1x128xf32>
      %25 = arith.addf %21, %24 : vector<1x128xf32>
      %26 = math.rsqrt %25 : vector<1x128xf32>
      %27 = vector.broadcast %26 : vector<1x128xf32> to vector<32x128xf32>
      %28 = arith.mulf %23, %27 : vector<32x128xf32>
      %c0_12 = arith.constant 0 : index
      %c0_13 = arith.constant 0 : index
      %29 = vector.load %arg3[%c0_12, %c0_13] : memref<1x128xf32, #tpu.memory_space<vmem>>, vector<1x128xf32>
      %30 = vector.broadcast %29 : vector<1x128xf32> to vector<32x128xf32>
      %31 = arith.mulf %28, %30 : vector<32x128xf32>
      %c0_14 = arith.constant 0 : index
      %c0_15 = arith.constant 0 : index
      %32 = vector.load %arg4[%c0_14, %c0_15] : memref<1x128xf32, #tpu.memory_space<vmem>>, vector<1x128xf32>
      %33 = vector.broadcast %32 : vector<1x128xf32> to vector<32x128xf32>
      %34 = arith.addf %31, %33 : vector<32x128xf32>
      %cst_16 = arith.constant 0.000000e+00 : f32
      %35 = vector.broadcast %cst_16 : f32 to vector<32x128xf32>
      %36 = arith.cmpf oge, %34, %35 : vector<32x128xf32>
      %cst_17 = arith.constant 2.000000e-01 : f32
      %37 = vector.broadcast %cst_17 : f32 to vector<32x128xf32>
      %38 = arith.mulf %37, %34 : vector<32x128xf32>
      %39 = arith.select %36, %34, %38 : vector<32x128xi1>, vector<32x128xf32>
      %c0_18 = arith.constant 0 : index
      %c0_19 = arith.constant 0 : index
      %40 = vector.load %arg5[%c0_18, %c0_19] : memref<32x128xf32, #tpu.memory_space<vmem>>, vector<32x128xf32>
      %41 = arith.mulf %39, %40 : vector<32x128xf32>
      %c0_20 = arith.constant 0 : index
      %c0_21 = arith.constant 0 : index
      %42 = vector.load %arg6[%c0_20, %c0_21] : memref<2x32xf32, #tpu.memory_space<vmem>>, vector<2x32xf32>
      %cst_22 = arith.constant dense<0.000000e+00> : vector<2x128xf32>
      %43 = tpu.matmul %42, %41, %cst_22 {dimension_numbers = #tpu.dot_dimension_numbers<[1], [0], [0], [1], [0, 0, 1, 1], [], []>} : vector<2x32xf32>, vector<32x128xf32>, vector<2x128xf32> -> vector<2x128xf32>
      %cst_23 = arith.constant dense<0.000000e+00> : vector<2xf32>
      %44 = vector.multi_reduction <add>, %43, %cst_23 [1] : vector<2x128xf32> to vector<2xf32>
      %45 = vector.shape_cast %44 : vector<2xf32> to vector<2x1xf32>
      %c0_24 = arith.constant 0 : index
      %c0_25 = arith.constant 0 : index
      %46 = vector.load %arg7[%c0_24, %c0_25] : memref<2x1xf32, #tpu.memory_space<vmem>>, vector<2x1xf32>
      %47 = arith.addf %45, %46 : vector<2x1xf32>
      %48 = arith.negf %47 : vector<2x1xf32>
      %49 = math.exp %48 : vector<2x1xf32>
      %cst_26 = arith.constant 1.000000e+00 : f32
      %50 = vector.broadcast %cst_26 : f32 to vector<2x1xf32>
      %51 = arith.addf %50, %49 : vector<2x1xf32>
      %52 = arith.divf %50, %51 : vector<2x1xf32>
      %c0_27 = arith.constant 0 : index
      %c0_28 = arith.constant 0 : index
      %53 = vector.load %arg8[%c0_27, %c0_28] : memref<2x1xf32, #tpu.memory_space<vmem>>, vector<2x1xf32>
      tpu.vector_store %arg8[%c0_27, %c0_28], %52 {strides = array<i32>} : memref<2x1xf32, #tpu.memory_space<vmem>>, vector<2x1xf32>,
    } else {
    }
    return
  }
  func.func @transform_0(%arg0: i32) -> (i32, i32) {
    %c0_i32 = arith.constant 0 : i32
    %c0_i32_0 = arith.constant 0 : i32
    return %arg0, %c0_i32 : i32, i32
  }
  func.func @transform_1(%arg0: i32) -> (i32, i32) {
    %c0_i32 = arith.constant 0 : i32
    %c0_i32_0 = arith.constant 0 : i32
    %c0_i32_1 = arith.constant 0 : i32
    return %c0_i32, %c0_i32_0 : i32, i32
  }
  func.func @transform_2(%arg0: i32) -> (i32, i32) {
    %c0_i32 = arith.constant 0 : i32
    %c0_i32_0 = arith.constant 0 : i32
    %c0_i32_1 = arith.constant 0 : i32
    return %c0_i32, %c0_i32_0 : i32, i32
  }
  func.func @transform_3(%arg0: i32) -> (i32, i32) {
    %c0_i32 = arith.constant 0 : i32
    %c0_i32_0 = arith.constant 0 : i32
    %c0_i32_1 = arith.constant 0 : i32
    return %c0_i32, %c0_i32_0 : i32, i32
  }
  func.func @transform_4(%arg0: i32) -> (i32, i32) {
    %c0_i32 = arith.constant 0 : i32
    %c0_i32_0 = arith.constant 0 : i32
    %c0_i32_1 = arith.constant 0 : i32
    return %c0_i32, %c0_i32_0 : i32, i32
  }
  func.func @transform_5(%arg0: i32) -> (i32, i32) {
    %c0_i32 = arith.constant 0 : i32
    %c0_i32_0 = arith.constant 0 : i32
    %c0_i32_1 = arith.constant 0 : i32
    return %c0_i32, %c0_i32_0 : i32, i32
  }
  func.func @transform_6(%arg0: i32) -> (i32, i32) {
    %c0_i32 = arith.constant 0 : i32
    %c0_i32_0 = arith.constant 0 : i32
    %c0_i32_1 = arith.constant 0 : i32
    return %c0_i32, %c0_i32_0 : i32, i32
  }
  func.func @transform_7(%arg0: i32) -> (i32, i32) {
    %c0_i32 = arith.constant 0 : i32
    %c0_i32_0 = arith.constant 0 : i32
    %c0_i32_1 = arith.constant 0 : i32
    return %c0_i32, %c0_i32_0 : i32, i32
  }
}

</mosaic_0001>

<bundles_post_ra>
// kernel: discriminator_forward.3
= control target key start
LH: loop header
LB: loop body
LE: loop exit
PB: predicated region body
PF: predicated region fallthrough
CT: control target
= control target key end

     0   :  { %s573_s12 = smov 0   ;;  %s650_s0 = inlined_call_operand.vmem [shape: bf16[512,48], index: 0, kind: input, shape index: {}]   ;;  %s651_s1 = inlined_call_operand.vmem [shape: bf16[48,128], index: 1, kind: input, shape index: {}]   ;;  %s652_s2 = inlined_call_operand.vmem [shape: f32[1,128], index: 2, kind: input, shape index: {}]   ;;  %s653_s3 = inlined_call_operand.vmem [shape: f32[512,128], index: 3, kind: output, shape index: {}]  }
   0x1 LB: > { %s453_s13 = sadd.s32 4294967295, %s551_s12   ;;  %p457_p0 = scmp.ge.s32.totalorder %s551_s12, 1  ;;  %s551_s12 = sphi %s573_s12, %s13_s12  }
   0x2   : > { %p138_p1 = scmp.lt.s32.totalorder %s551_s12, 5 }
   0x4   : > { %p139_p2 = pnand %p457_p0, %p138_p1 }
   0x5   : > { %s458_s16 = sshll.u32 (!%p139_p2), %s453_s13, 4 }
   0x6   : > { %142 = sbr.rel (%p139_p2) target bundleno = 187 (0xbb), region = 32  ;;  %p163_p3 = scmp.lt.s32.totalorder (!%p139_p2), %s458_s16, 63 }
   0xb   : > { %v526_v0 = vld [vmem:[%s651_s1 + $0x10] sm:$0xff]  ;;  %v525_v1 = vld [vmem:[%s651_s1 + $0x8] sm:$0xff]  ;;  %s655_s16 = smov (!%p163_p3, %s458_s16), 63  ;;  %v524_v2 = vld [vmem:[%s651_s1] sm:$0xff]  ;;  %vm259_vm0 = vcmask 392192  }
   0xc   : > { %289 = vmatpush.bf16.msra.mxu0 %v526_v0  ;;  %527 = vmatpush.bf16.msra.mxu1 %v526_v0  ;;  %s459_s19 = sshll.u32 %s655_s16, 2  ;;  %v607_v11 = vld [vmem:[%s652_s2] ss:$0 sm:$0xff]  ;;  %s461_s27 = sshll.u32 %s655_s16, 3 }
   0xd   : > { %528 = vmatpush.bf16.msra.mxu2 %v526_v0  ;;  %529 = vmatpush.bf16.msra.mxu3 %v526_v0  ;;  %s166_s24 = scalar_lea.vmem %s650_s0, %s459_s19  ;;  %s615_s30 = scalar_lea.vmem %s653_s3, %s461_s27 }
   0xe   : > { %v516_v3 = vld [vmem:[%s166_s24] sm:$0xff]  ;;  %v518_v4 = vld [vmem:[%s166_s24 + $0x10] sm:$0xff]  ;;  %v517_v7 = vld [vmem:[%s166_s24 + $0x8] sm:$0xff] }
   0xf   : > { %v520_v5 = vld [vmem:[%s166_s24 + $0x20] sm:$0xff]  ;;  %v522_v6 = vld [vmem:[%s166_s24 + $0x30] sm:$0xff]  ;;  %v519_v8 = vld [vmem:[%s166_s24 + $0x18] sm:$0xff] }
  0x10   : > { %290 = vmatpush.bf16.msra.mxu0 %v525_v1  ;;  %530 = vmatpush.bf16.msra.mxu1 %v525_v1  ;;  %v521_v9 = vld [vmem:[%s166_s24 + $0x28] sm:$0xff]  ;;  %v523_v10 = vld [vmem:[%s166_s24 + $0x38] sm:$0xff] }
  0x11   : > { %531 = vmatpush.bf16.msra.mxu2 %v525_v1  ;;  %532 = vmatpush.bf16.msra.mxu3 %v525_v1 }
  0x14   : > { %291 = vmatpush.bf16.msra.mxu0 %v524_v2  ;;  %533 = vmatpush.bf16.msra.mxu1 %v524_v2 }
  0x15   : > { %534 = vmatpush.bf16.msra.mxu2 %v524_v2  ;;  %535 = vmatpush.bf16.msra.mxu3 %v524_v2 }
  0x17   : > { %506 = vmatmul.msk.bf16.vlgmr.msra.gmra.mxu0 %vm259_vm0, %v516_v3  ;;  %508 = vmatmul.msk.bf16.vlgmr.msra.gmra.mxu1 %vm259_vm0, %v518_v4 }
  0x18   : > { %510 = vmatmul.msk.bf16.vlgmr.msra.gmra.mxu2 %vm259_vm0, %v520_v5  ;;  %512 = vmatmul.msk.bf16.vlgmr.msra.gmra.mxu3 %vm259_vm0, %v522_v6 }
  0x27   : > { %507 = vmatmul.msk.bf16.gmra.mxu0 %vm259_vm0, %v517_v7  ;;  %509 = vmatmul.msk.bf16.gmra.mxu1 %vm259_vm0, %v519_v8 }
  0x28   : > { %511 = vmatmul.msk.bf16.gmra.mxu2 %vm259_vm0, %v521_v9  ;;  %513 = vmatmul.msk.bf16.gmra.mxu3 %vm259_vm0, %v523_v10 }
  0x94   : > { %v293_v12 = vpop.f32.mrf.mxu0  ;;  %v303_v13 = vpop.f32.mrf.mxu1 }
  0x95   : > { %v294_v14 = vadd.f32 %v607_v11, %v293_v12  ;;  %v304_v15 = vadd.f32 %v607_v11, %v303_v13 }
  0x97   : > { %vm333_vm1 = vcmp.ge.f32.partialorder %v294_v14, 0.0  ;;  %v349_v16 = vmul.f32 0.2, %v294_v14  ;;  %vm337_vm2 = vcmp.ge.f32.partialorder %v304_v15, 0.0  ;;  %v353_v17 = vmul.f32 0.2, %v304_v15 }
  0x99   : > { %v365_v18 = vsel %vm333_vm1, %v294_v14, %v349_v16  ;;  %v369_v19 = vsel %vm337_vm2, %v304_v15, %v353_v17 }
  0x9a   : > { %381 = vst [vmem:[%s615_s30] sm:$0xff] %v365_v18 }
  0x9b   : > { %385 = vst [vmem:[%s615_s30 + $0x20] sm:$0xff] %v369_v19  ;;  %v313_v20 = vpop.f32.mrf.mxu2  ;;  %v323_v21 = vpop.f32.mrf.mxu3 }
  0x9c   : > { %v314_v22 = vadd.f32 %v607_v11, %v313_v20  ;;  %v324_v23 = vadd.f32 %v607_v11, %v323_v21  ;;  %v295_v24 = vpop.f32.mrf.mxu0  ;;  %v305_v25 = vpop.f32.mrf.mxu1 }
  0x9d   : > { %v296_v26 = vadd.f32 %v607_v11, %v295_v24  ;;  %v306_v27 = vadd.f32 %v607_v11, %v305_v25 }
  0x9e   : > { %vm341_vm3 = vcmp.ge.f32.partialorder %v314_v22, 0.0  ;;  %v357_v28 = vmul.f32 0.2, %v314_v22  ;;  %vm345_vm4 = vcmp.ge.f32.partialorder %v324_v23, 0.0  ;;  %v361_v29 = vmul.f32 0.2, %v324_v23 }
  0x9f   : > { %vm334_vm5 = vcmp.ge.f32.partialorder %v296_v26, 0.0  ;;  %v350_v30 = vmul.f32 0.2, %v296_v26  ;;  %vm338_vm6 = vcmp.ge.f32.partialorder %v306_v27, 0.0  ;;  %v354_v31 = vmul.f32 0.2, %v306_v27 }
  0xa0   : > { %v373_v32 = vsel %vm341_vm3, %v314_v22, %v357_v28  ;;  %v377_v33 = vsel %vm345_vm4, %v324_v23, %v361_v29 }
  0xa1   : > { %389 = vst [vmem:[%s615_s30 + $0x40] sm:$0xff] %v373_v32  ;;  %v366_v34 = vsel %vm334_vm5, %v296_v26, %v350_v30  ;;  %v370_v35 = vsel %vm338_vm6, %v306_v27, %v354_v31 }
  0xa2   : > { %393 = vst [vmem:[%s615_s30 + $0x60] sm:$0xff] %v377_v33 }
  0xa3   : > { %382 = vst [vmem:[%s615_s30 + $0x8] sm:$0xff] %v366_v34  ;;  %v315_v36 = vpop.f32.mrf.mxu2  ;;  %v325_v37 = vpop.f32.mrf.mxu3 }
  0xa4   : > { %386 = vst [vmem:[%s615_s30 + $0x28] sm:$0xff] %v370_v35  ;;  %v316_v38 = vadd.f32 %v607_v11, %v315_v36  ;;  %v326_v39 = vadd.f32 %v607_v11, %v325_v37  ;;  %v298_v40 = vpop.f32.mrf.mxu0  ;;  %v308_v41 = vpop.f32.mrf.mxu1 }
  0xa5   : > { %v299_v42 = vadd.f32 %v607_v11, %v298_v40  ;;  %v309_v43 = vadd.f32 %v607_v11, %v308_v41 }
  0xa6   : > { %vm342_vm7 = vcmp.ge.f32.partialorder %v316_v38, 0.0  ;;  %v358_v44 = vmul.f32 0.2, %v316_v38  ;;  %vm346_vm8 = vcmp.ge.f32.partialorder %v326_v39, 0.0  ;;  %v362_v45 = vmul.f32 0.2, %v326_v39 }
  0xa7   : > { %vm335_vm9 = vcmp.ge.f32.partialorder %v299_v42, 0.0  ;;  %v351_v46 = vmul.f32 0.2, %v299_v42  ;;  %vm339_vm10 = vcmp.ge.f32.partialorder %v309_v43, 0.0  ;;  %v355_v47 = vmul.f32 0.2, %v309_v43 }
  0xa8   : > { %v374_v48 = vsel %vm342_vm7, %v316_v38, %v358_v44  ;;  %v378_v49 = vsel %vm346_vm8, %v326_v39, %v362_v45 }
  0xa9   : > { %390 = vst [vmem:[%s615_s30 + $0x48] sm:$0xff] %v374_v48  ;;  %v367_v50 = vsel %vm335_vm9, %v299_v42, %v351_v46  ;;  %v371_v51 = vsel %vm339_vm10, %v309_v43, %v355_v47 }
  0xaa   : > { %394 = vst [vmem:[%s615_s30 + $0x68] sm:$0xff] %v378_v49 }
  0xab   : > { %383 = vst [vmem:[%s615_s30 + $0x10] sm:$0xff] %v367_v50  ;;  %v318_v52 = vpop.f32.mrf.mxu2  ;;  %v328_v53 = vpop.f32.mrf.mxu3 }
  0xac   : > { %387 = vst [vmem:[%s615_s30 + $0x30] sm:$0xff] %v371_v51  ;;  %v319_v54 = vadd.f32 %v607_v11, %v318_v52  ;;  %v329_v55 = vadd.f32 %v607_v11, %v328_v53  ;;  %v300_v56 = vpop.f32.mrf.mxu0  ;;  %v310_v57 = vpop.f32.mrf.mxu1 }
  0xad   : > { %v301_v58 = vadd.f32 %v607_v11, %v300_v56  ;;  %v311_v59 = vadd.f32 %v607_v11, %v310_v57 }
  0xae   : > { %vm343_vm11 = vcmp.ge.f32.partialorder %v319_v54, 0.0  ;;  %v359_v60 = vmul.f32 0.2, %v319_v54  ;;  %vm347_vm12 = vcmp.ge.f32.partialorder %v329_v55, 0.0  ;;  %v363_v61 = vmul.f32 0.2, %v329_v55 }
  0xaf   : > { %vm336_vm13 = vcmp.ge.f32.partialorder %v301_v58, 0.0  ;;  %v352_v62 = vmul.f32 0.2, %v301_v58  ;;  %vm340_vm14 = vcmp.ge.f32.partialorder %v311_v59, 0.0  ;;  %v356_v63 = vmul.f32 0.2, %v311_v59 }
  0xb0   : > { %v375_v0 = vsel %vm343_vm11, %v319_v54, %v359_v60  ;;  %v379_v1 = vsel %vm347_vm12, %v329_v55, %v363_v61 }
  0xb1   : > { %391 = vst [vmem:[%s615_s30 + $0x50] sm:$0xff] %v375_v0  ;;  %v368_v2 = vsel %vm336_vm13, %v301_v58, %v352_v62  ;;  %v372_v3 = vsel %vm340_vm14, %v311_v59, %v356_v63 }
  0xb2   : > { %395 = vst [vmem:[%s615_s30 + $0x70] sm:$0xff] %v379_v1 }
  0xb3   : > { %384 = vst [vmem:[%s615_s30 + $0x18] sm:$0xff] %v368_v2  ;;  %v320_v4 = vpop.f32.mrf.mxu2  ;;  %v330_v5 = vpop.f32.mrf.mxu3 }
  0xb4   : > { %388 = vst [vmem:[%s615_s30 + $0x38] sm:$0xff] %v372_v3  ;;  %v321_v6 = vadd.f32 %v607_v11, %v320_v4  ;;  %v331_v7 = vadd.f32 %v607_v11, %v330_v5 }
  0xb6   : > { %vm344_vm15 = vcmp.ge.f32.partialorder %v321_v6, 0.0  ;;  %v360_v8 = vmul.f32 0.2, %v321_v6  ;;  %vm348_vm0 = vcmp.ge.f32.partialorder %v331_v7, 0.0  ;;  %v364_v9 = vmul.f32 0.2, %v331_v7 }
  0xb8   : > { %v376_v10 = vsel %vm344_vm15, %v321_v6, %v360_v8  ;;  %v380_v12 = vsel %vm348_vm0, %v331_v7, %v364_v9 }
  0xb9   : > { %392 = vst [vmem:[%s615_s30 + $0x58] sm:$0xff] %v376_v10 }
  0xba   : > { %396 = vst [vmem:[%s615_s30 + $0x78] sm:$0xff] %v380_v12 }
  0xbb PF: > { %s13_s12 = sadd.s32 1, %s551_s12  }
  0xbc   : > { %p10_p4 = scmp.ge.s32.totalorder %s13_s12, 6  }
  0xbe   :  { %12 = sbr.rel (!%p10_p4) target bundleno = 1 (0x1), region = 62 }

// kernel: discriminator_forward.4
= control target key start
LH: loop header
LB: loop body
LE: loop exit
PB: predicated region body
PF: predicated region fallthrough
CT: control target
= control target key end

     0   :  { %s718_s15 = smov 0   ;;  %s1045_s0 = inlined_call_operand.vmem [shape: bf16[128,128], index: 0, kind: input, shape index: {}]   ;;  %s1046_s1 = inlined_call_operand.vmem [shape: bf16[128,128], index: 1, kind: input, shape index: {}]   ;;  %s1047_s2 = inlined_call_operand.vmem [shape: f32[1,128], index: 2, kind: input, shape index: {}]   ;;  %s1048_s3 = inlined_call_operand.vmem [shape: f32[1,128], index: 3, kind: input, shape index: {}]   ;;  %s1049_s4 = inlined_call_operand.vmem [shape: f32[128,128], index: 4, kind: output, shape index: {}]  }
   0x1 LB: > { %s724_s16 = sadd.s32 4294967295, %s691_s15   ;;  %p582_p0 = scmp.ge.s32.totalorder %s691_s15, 1  ;;  %s691_s15 = sphi %s718_s15, %s14_s15  }
   0x2   : > { %p158_p1 = scmp.lt.s32.totalorder %s691_s15, 3 }
   0x4   : > { %p159_p2 = pnand %p582_p0, %p158_p1 }
   0x5   : > { %s583_s25 = sshll.u32 (!%p159_p2), %s724_s16, 3  ;;  %s585_s12 = sshll.u32 (!%p159_p2), %s724_s16, 6 }
   0x6   : > { %162 = sbr.rel (%p159_p2) target bundleno = 290 (0x122), region = 36  ;;  %p180_p3 = scmp.lt.s32.totalorder (!%p159_p2), %s583_s25, 15 }
   0x7   : > { %s311_s17 = scalar_lea.vmem (!%p159_p2), %s1049_s4, %s585_s12  ;;  %p634_p4 = scmp.ne.s32.totalorder (!%p159_p2), %s724_s16, 1 }
   0xb   : > { %v648_v0 = vld [vmem:[%s1046_s1 + $0x38] sm:$0xff]  ;;  %v647_v1 = vld [vmem:[%s1046_s1 + $0x30] sm:$0xff]  ;;  %v646_v2 = vld [vmem:[%s1046_s1 + $0x28] sm:$0xff]  ;;  %s1051_s25 = smov (!%p180_p3, %s583_s25), 15 }
   0xc   : > { %282 = vmatpush.bf16.msra.mxu0 %v648_v0  ;;  %649 = vmatpush.bf16.msra.mxu1 %v648_v0  ;;  %v645_v3 = vld [vmem:[%s1046_s1 + $0x20] sm:$0xff]  ;;  %v644_v4 = vld [vmem:[%s1046_s1 + $0x18] sm:$0xff]  ;;  %v643_v5 = vld [vmem:[%s1046_s1 + $0x10] sm:$0xff]  ;;  %s584_s6 = sshll.u32 %s1051_s25, 2 }
   0xd   : > { %650 = vmatpush.bf16.msra.mxu2 %v648_v0  ;;  %651 = vmatpush.bf16.msra.mxu3 %v648_v0  ;;  %v642_v6 = vld [vmem:[%s1046_s1 + $0x8] sm:$0xff]  ;;  %v641_v7 = vld [vmem:[%s1046_s1] sm:$0xff]  ;;  %s183_s11 = scalar_lea.vmem %s1045_s0, %s584_s6 }
   0xe   : > { %v637_v8 = vld [vmem:[%s183_s11] sm:$0xff]  ;;  %v638_v9 = vld [vmem:[%s183_s11 + $0x8] sm:$0xff]  ;;  %v639_v10 = vld [vmem:[%s183_s11 + $0x10] sm:$0xff] }
   0xf   : > { %v640_v11 = vld [vmem:[%s183_s11 + $0x18] sm:$0xff] }
  0x10   : > { %283 = vmatpush.bf16.msra.mxu0 %v647_v1  ;;  %652 = vmatpush.bf16.msra.mxu1 %v647_v1 }
  0x11   : > { %653 = vmatpush.bf16.msra.mxu2 %v647_v1  ;;  %654 = vmatpush.bf16.msra.mxu3 %v647_v1 }
  0x14   : > { %284 = vmatpush.bf16.msra.mxu0 %v646_v2  ;;  %655 = vmatpush.bf16.msra.mxu1 %v646_v2 }
  0x15   : > { %656 = vmatpush.bf16.msra.mxu2 %v646_v2  ;;  %657 = vmatpush.bf16.msra.mxu3 %v646_v2 }
  0x18   : > { %285 = vmatpush.bf16.msra.mxu0 %v645_v3  ;;  %658 = vmatpush.bf16.msra.mxu1 %v645_v3 }
  0x19   : > { %659 = vmatpush.bf16.msra.mxu2 %v645_v3  ;;  %660 = vmatpush.bf16.msra.mxu3 %v645_v3 }
  0x1c   : > { %286 = vmatpush.bf16.msra.mxu0 %v644_v4  ;;  %661 = vmatpush.bf16.msra.mxu1 %v644_v4 }
  0x1d   : > { %662 = vmatpush.bf16.msra.mxu2 %v644_v4  ;;  %663 = vmatpush.bf16.msra.mxu3 %v644_v4 }
  0x20   : > { %287 = vmatpush.bf16.msra.mxu0 %v643_v5  ;;  %664 = vmatpush.bf16.msra.mxu1 %v643_v5 }
  0x21   : > { %665 = vmatpush.bf16.msra.mxu2 %v643_v5  ;;  %666 = vmatpush.bf16.msra.mxu3 %v643_v5 }
  0x24   : > { %288 = vmatpush.bf16.msra.mxu0 %v642_v6  ;;  %667 = vmatpush.bf16.msra.mxu1 %v642_v6 }
  0x25   : > { %668 = vmatpush.bf16.msra.mxu2 %v642_v6  ;;  %669 = vmatpush.bf16.msra.mxu3 %v642_v6 }
  0x28   : > { %289 = vmatpush.bf16.msra.mxu0 %v641_v7  ;;  %670 = vmatpush.bf16.msra.mxu1 %v641_v7 }
  0x29   : > { %671 = vmatpush.bf16.msra.mxu2 %v641_v7  ;;  %672 = vmatpush.bf16.msra.mxu3 %v641_v7 }
  0x2b   : > { %290 = vmatmul.bf16.vlgmr.msra.gmra.mxu0 %v637_v8  ;;  %295 = vmatmul.bf16.vlgmr.msra.gmra.mxu1 %v638_v9 }
  0x2c   : > { %300 = vmatmul.bf16.vlgmr.msra.gmra.mxu2 %v639_v10  ;;  %305 = vmatmul.bf16.vlgmr.msra.gmra.mxu3 %v640_v11 }
  0xa8   : > { %v291_v12 = vpop.f32.mrf.mxu0  ;;  %v296_v13 = vpop.f32.mrf.mxu1 }
  0xa9   : > { %312 = vst [vmem:[%s311_s17] sm:$0xff] %v291_v12 }
  0xaa   : > { %314 = vst [vmem:[%s311_s17 + $0x10] sm:$0xff] %v296_v13 }
  0xaf   : > { %v301_v14 = vpop.f32.mrf.mxu2  ;;  %v306_v15 = vpop.f32.mrf.mxu3 }
  0xb0   : > { %316 = vst [vmem:[%s311_s17 + $0x20] sm:$0xff] %v301_v14  ;;  %v293_v16 = vpop.f32.mrf.mxu0  ;;  %v298_v17 = vpop.f32.mrf.mxu1 }
  0xb1   : > { %318 = vst [vmem:[%s311_s17 + $0x30] sm:$0xff] %v306_v15 }
  0xb2   : > { %313 = vst [vmem:[%s311_s17 + $0x8] sm:$0xff] %v293_v16 }
  0xb3   : > { %315 = vst [vmem:[%s311_s17 + $0x18] sm:$0xff] %v298_v17 }
  0xb5   : > { %323 = sbr.rel (%p634_p4) target bundleno = 290 (0x122), region = 40 }
  0xb7   : > { %v303_v18 = vpop.f32.mrf.mxu2  ;;  %v308_v19 = vpop.f32.mrf.mxu3 }
  0xb8   : > { %317 = vst [vmem:[%s311_s17 + $0x28] sm:$0xff] %v303_v18 }
  0xb9   : > { %319 = vst [vmem:[%s311_s17 + $0x38] sm:$0xff] %v308_v19 }
  0xc0   : > { %v764_v20 = vld [vmem:[%s1049_s4] sm:$0xff]  ;;  %v769_v21 = vld [vmem:[%s1049_s4 + $0x8] sm:$0xff]  ;;  %v774_v22 = vld [vmem:[%s1049_s4 + $0x10] sm:$0xff] }
  0xc1   : > { %v779_v23 = vld [vmem:[%s1049_s4 + $0x18] sm:$0xff]  ;;  %v340_v24 = vadd.f32 %v769_v21, %v764_v20  ;;  %v362_v25 = vmul.f32 %v764_v20, %v764_v20  ;;  %v363_v26 = vmul.f32 %v769_v21, %v769_v21  ;;  %v364_v27 = vmul.f32 %v774_v22, %v774_v22  ;;  %v792_v28 = vld [vmem:[%s1049_s4 + $0x20] sm:$0xff]  ;;  %v800_v32 = vld [vmem:[%s1049_s4 + $0x28] sm:$0xff] }
  0xc2   : > { %v365_v30 = vmul.f32 %v779_v23, %v779_v23  ;;  %v366_v34 = vmul.f32 %v792_v28, %v792_v28  ;;  %v808_v36 = vld [vmem:[%s1049_s4 + $0x30] sm:$0xff]  ;;  %v367_v38 = vmul.f32 %v800_v32, %v800_v32  ;;  %v816_v40 = vld [vmem:[%s1049_s4 + $0x38] sm:$0xff]  ;;  %v824_v44 = vld [vmem:[%s1049_s4 + $0x40] sm:$0xff] }
  0xc3   : > { %v341_v29 = vadd.f32 %v340_v24, %v774_v22  ;;  %v378_v31 = vadd.f32 %v363_v26, %v362_v25  ;;  %v368_v42 = vmul.f32 %v808_v36, %v808_v36  ;;  %v369_v46 = vmul.f32 %v816_v40, %v816_v40  ;;  %v832_v48 = vld [vmem:[%s1049_s4 + $0x48] sm:$0xff]  ;;  %v840_v52 = vld [vmem:[%s1049_s4 + $0x50] sm:$0xff]  ;;  %v848_v56 = vld [vmem:[%s1049_s4 + $0x58] sm:$0xff] }
  0xc4   : > { %v370_v50 = vmul.f32 %v824_v44, %v824_v44  ;;  %v371_v54 = vmul.f32 %v832_v48, %v832_v48  ;;  %v372_v58 = vmul.f32 %v840_v52, %v840_v52  ;;  %v856_v60 = vld [vmem:[%s1049_s4 + $0x60] sm:$0xff]  ;;  %v373_v62 = vmul.f32 %v848_v56, %v848_v56  ;;  %v864_v0 = vld [vmem:[%s1049_s4 + $0x68] sm:$0xff]  ;;  %v872_v4 = vld [vmem:[%s1049_s4 + $0x70] sm:$0xff] }
  0xc5   : > { %v342_v33 = vadd.f32 %v341_v29, %v779_v23  ;;  %v379_v35 = vadd.f32 %v378_v31, %v364_v27  ;;  %v374_v2 = vmul.f32 %v856_v60, %v856_v60  ;;  %v375_v6 = vmul.f32 %v864_v0, %v864_v0  ;;  %v880_v8 = vld [vmem:[%s1049_s4 + $0x78] sm:$0xff] }
  0xc6   : > { %v376_v10 = vmul.f32 %v872_v4, %v872_v4  ;;  %v377_v13 = vmul.f32 %v880_v8, %v880_v8 }
  0xc7   : > { %v343_v37 = vadd.f32 %v342_v33, %v792_v28  ;;  %v380_v39 = vadd.f32 %v379_v35, %v365_v30 }
  0xc9   : > { %v344_v41 = vadd.f32 %v343_v37, %v800_v32  ;;  %v381_v43 = vadd.f32 %v380_v39, %v366_v34 }
  0xcb   : > { %v345_v45 = vadd.f32 %v344_v41, %v808_v36  ;;  %v382_v47 = vadd.f32 %v381_v43, %v367_v38 }
  0xcd   : > { %v346_v49 = vadd.f32 %v345_v45, %v816_v40  ;;  %v383_v51 = vadd.f32 %v382_v47, %v368_v42 }
  0xcf   : > { %v347_v53 = vadd.f32 %v346_v49, %v824_v44  ;;  %v384_v55 = vadd.f32 %v383_v51, %v369_v46 }
  0xd1   : > { %v348_v57 = vadd.f32 %v347_v53, %v832_v48  ;;  %v385_v59 = vadd.f32 %v384_v55, %v370_v50 }
  0xd3   : > { %v349_v61 = vadd.f32 %v348_v57, %v840_v52  ;;  %v386_v63 = vadd.f32 %v385_v59, %v371_v54 }
  0xd5   : > { %v350_v1 = vadd.f32 %v349_v61, %v848_v56  ;;  %v387_v3 = vadd.f32 %v386_v63, %v372_v58 }
  0xd7   : > { %v351_v5 = vadd.f32 %v350_v1, %v856_v60  ;;  %v388_v7 = vadd.f32 %v387_v3, %v373_v62 }
  0xd9   : > { %v352_v9 = vadd.f32 %v351_v5, %v864_v0  ;;  %v389_v11 = vadd.f32 %v388_v7, %v374_v2 }
  0xdb   : > { %v353_v12 = vadd.f32 %v352_v9, %v872_v4  ;;  %v390_v14 = vadd.f32 %v389_v11, %v375_v6 }
  0xdd   : > { %v354_v15 = vadd.f32 %v353_v12, %v880_v8  ;;  %v391_v16 = vadd.f32 %v390_v14, %v376_v10 }
  0xdf   : > { %v355_v17 = vrot.slane %v354_v15, 4  ;;  %v392_v18 = vadd.f32 %v391_v16, %v377_v13 }
  0xe1   : > { %v356_v19 = vadd.f32 %v355_v17, %v354_v15  ;;  %v393_v24 = vrot.slane %v392_v18, 4 }
  0xe3   : > { %v357_v25 = vrot.slane %v356_v19, 2  ;;  %v394_v26 = vadd.f32 %v393_v24, %v392_v18 }
  0xe5   : > { %v358_v27 = vadd.f32 %v357_v25, %v356_v19  ;;  %v395_v29 = vrot.slane %v394_v26, 2 }
  0xe7   : > { %v359_v30 = vrot.slane %v358_v27, 1  ;;  %v396_v31 = vadd.f32 %v395_v29, %v394_v26 }
  0xe9   : > { %v360_v33 = vadd.f32 %v359_v30, %v358_v27  ;;  %v397_v34 = vrot.slane %v396_v31, 1 }
  0xeb   : > { %v889_v35 = vmul.f32 0.0078125, %v360_v33  ;;  %v398_v37 = vadd.f32 %v397_v34, %v396_v31 }
  0xed   : > { %v400_v38 = vmul.f32 %v889_v35, %v889_v35  ;;  %v399_v39 = vmul.f32 0.0078125, %v398_v37  ;;  %v402_v49 = vsub.f32 %v764_v20, %v889_v35  ;;  %v403_v51 = vsub.f32 %v769_v21, %v889_v35 }
  0xee   : > { %v404_v53 = vsub.f32 %v774_v22, %v889_v35  ;;  %v405_v54 = vsub.f32 %v779_v23, %v889_v35  ;;  %v406_v55 = vsub.f32 %v792_v28, %v889_v35  ;;  %v407_v57 = vsub.f32 %v800_v32, %v889_v35  ;;  %v914_v22 = vld [vmem:[%s1047_s2] ss:$0 sm:$0xff] }
  0xef   : > { %v401_v41 = vsub.f32 %v399_v39, %v400_v38  ;;  %v408_v20 = vsub.f32 %v808_v36, %v889_v35  ;;  %v409_v21 = vsub.f32 %v816_v40, %v889_v35  ;;  %v410_v59 = vsub.f32 %v824_v44, %v889_v35 }
  0xf0   : > { %v411_v23 = vsub.f32 %v832_v48, %v889_v35  ;;  %v412_v28 = vsub.f32 %v840_v52, %v889_v35  ;;  %v413_v32 = vsub.f32 %v848_v56, %v889_v35  ;;  %v414_v36 = vsub.f32 %v856_v60, %v889_v35  ;;  %v936_v52 = vld [vmem:[%s1048_s3] ss:$0 sm:$0xff] }
  0xf1   : > { %v418_v42 = vadd.f32 1e-05, %v401_v41  ;;  %v415_v44 = vsub.f32 %v864_v0, %v889_v35  ;;  %v416_v61 = vsub.f32 %v872_v4, %v889_v35  ;;  %v417_v48 = vsub.f32 %v880_v8, %v889_v35 }
  0xf3   : > { %683 = vrsqrt.f32 %v418_v42  ;;  %vm425_vm0 = vweird.f32 %v418_v42 }
  0xf9   : > { %v684_v43 = vpop.eup %683 }
  0xfa   : > { %v420_v45 = vmul.f32 %v684_v43, %v418_v42  ;;  %vm426_vm1 = vweird.f32 %v684_v43 }
  0xfb   : > { %vm427_vm2 = vmor %vm425_vm0, %vm426_vm1 }
  0xfc   : > { %v421_v46 = vmul.f32 %v684_v43, %v420_v45 }
  0xfe   : > { %v422_v47 = vmul.f32 0.5, %v421_v46 }
 0x100   : > { %v423_v50 = vsub.f32 1.5, %v422_v47 }
 0x102   : > { %v424_v58 = vmul.f32 %v684_v43, %v423_v50 }
 0x104   : > { %v924_v40 = vsel %vm427_vm2, %v684_v43, %v424_v58 }
 0x105   : > { %v429_v62 = vmul.f32 %v924_v40, %v402_v49  ;;  %v430_v56 = vmul.f32 %v924_v40, %v403_v51  ;;  %v431_v60 = vmul.f32 %v924_v40, %v404_v53  ;;  %v432_v63 = vmul.f32 %v924_v40, %v405_v54 }
 0x106   : > { %v433_v1 = vmul.f32 %v924_v40, %v406_v55  ;;  %v434_v2 = vmul.f32 %v924_v40, %v407_v57  ;;  %v435_v3 = vmul.f32 %v924_v40, %v408_v20  ;;  %v436_v5 = vmul.f32 %v924_v40, %v409_v21 }
 0x107   : > { %v449_v6 = vmul.f32 %v914_v22, %v429_v62  ;;  %v450_v7 = vmul.f32 %v914_v22, %v430_v56  ;;  %v451_v9 = vmul.f32 %v914_v22, %v431_v60  ;;  %v452_v10 = vmul.f32 %v914_v22, %v432_v63 }
 0x108   : > { %v453_v11 = vmul.f32 %v914_v22, %v433_v1  ;;  %v454_v12 = vmul.f32 %v914_v22, %v434_v2  ;;  %v455_v13 = vmul.f32 %v914_v22, %v435_v3  ;;  %v456_v14 = vmul.f32 %v914_v22, %v436_v5 }
 0x109   : > { %v469_v15 = vadd.f32 %v936_v52, %v449_v6  ;;  %v470_v16 = vadd.f32 %v936_v52, %v450_v7  ;;  %v471_v17 = vadd.f32 %v936_v52, %v451_v9  ;;  %v472_v18 = vadd.f32 %v936_v52, %v452_v10 }
 0x10a   : > { %v473_v19 = vadd.f32 %v936_v52, %v453_v11  ;;  %v474_v24 = vadd.f32 %v936_v52, %v454_v12  ;;  %v475_v25 = vadd.f32 %v936_v52, %v455_v13  ;;  %v476_v26 = vadd.f32 %v936_v52, %v456_v14 }
 0x10b   : > { %vm485_vm3 = vcmp.ge.f32.partialorder %v469_v15, 0.0  ;;  %v501_v27 = vmul.f32 0.2, %v469_v15  ;;  %vm486_vm4 = vcmp.ge.f32.partialorder %v470_v16, 0.0  ;;  %v502_v29 = vmul.f32 0.2, %v470_v16 }
 0x10c   : > { %vm487_vm5 = vcmp.ge.f32.partialorder %v471_v17, 0.0  ;;  %v503_v30 = vmul.f32 0.2, %v471_v17  ;;  %vm488_vm6 = vcmp.ge.f32.partialorder %v472_v18, 0.0  ;;  %v504_v31 = vmul.f32 0.2, %v472_v18 }
 0x10d   : > { %v517_v33 = vsel %vm485_vm3, %v469_v15, %v501_v27  ;;  %v518_v34 = vsel %vm486_vm4, %v470_v16, %v502_v29  ;;  %vm489_vm7 = vcmp.ge.f32.partialorder %v473_v19, 0.0  ;;  %v505_v37 = vmul.f32 0.2, %v473_v19 }
 0x10e   : > { %533 = vst [vmem:[%s1049_s4] sm:$0xff] %v517_v33  ;;  %v519_v38 = vsel %vm487_vm5, %v471_v17, %v503_v30  ;;  %v520_v39 = vsel %vm488_vm6, %v472_v18, %v504_v31  ;;  %vm490_vm8 = vcmp.ge.f32.partialorder %v474_v24, 0.0  ;;  %v506_v41 = vmul.f32 0.2, %v474_v24 }
 0x10f   : > { %534 = vst [vmem:[%s1049_s4 + $0x8] sm:$0xff] %v518_v34  ;;  %v521_v42 = vsel %vm489_vm7, %v473_v19, %v505_v37  ;;  %vm491_vm9 = vcmp.ge.f32.partialorder %v475_v25, 0.0  ;;  %v507_v43 = vmul.f32 0.2, %v475_v25  ;;  %vm492_vm10 = vcmp.ge.f32.partialorder %v476_v26, 0.0 }
 0x110   : > { %535 = vst [vmem:[%s1049_s4 + $0x10] sm:$0xff] %v519_v38  ;;  %v522_v45 = vsel %vm490_vm8, %v474_v24, %v506_v41  ;;  %v508_v46 = vmul.f32 0.2, %v476_v26  ;;  %v437_v47 = vmul.f32 %v924_v40, %v410_v59  ;;  %v438_v49 = vmul.f32 %v924_v40, %v411_v23 }
 0x111   : > { %536 = vst [vmem:[%s1049_s4 + $0x18] sm:$0xff] %v520_v39  ;;  %v523_v50 = vsel %vm491_vm9, %v475_v25, %v507_v43  ;;  %v439_v51 = vmul.f32 %v924_v40, %v412_v28  ;;  %v440_v53 = vmul.f32 %v924_v40, %v413_v32  ;;  %v441_v54 = vmul.f32 %v924_v40, %v414_v36 }
 0x112   : > { %537 = vst [vmem:[%s1049_s4 + $0x20] sm:$0xff] %v521_v42  ;;  %v524_v55 = vsel %vm492_vm10, %v476_v26, %v508_v46  ;;  %v457_v57 = vmul.f32 %v914_v22, %v437_v47  ;;  %v458_v58 = vmul.f32 %v914_v22, %v438_v49  ;;  %v442_v20 = vmul.f32 %v924_v40, %v415_v44 }
 0x113   : > { %538 = vst [vmem:[%s1049_s4 + $0x28] sm:$0xff] %v522_v45  ;;  %v459_v21 = vmul.f32 %v914_v22, %v439_v51  ;;  %v460_v59 = vmul.f32 %v914_v22, %v440_v53  ;;  %v461_v23 = vmul.f32 %v914_v22, %v441_v54  ;;  %v443_v28 = vmul.f32 %v924_v40, %v416_v61 }
 0x114   : > { %539 = vst [vmem:[%s1049_s4 + $0x30] sm:$0xff] %v523_v50  ;;  %v477_v0 = vadd.f32 %v936_v52, %v457_v57  ;;  %v478_v32 = vadd.f32 %v936_v52, %v458_v58  ;;  %v462_v36 = vmul.f32 %v914_v22, %v442_v20  ;;  %v444_v44 = vmul.f32 %v924_v40, %v417_v48 }
 0x115   : > { %540 = vst [vmem:[%s1049_s4 + $0x38] sm:$0xff] %v524_v55  ;;  %v479_v4 = vadd.f32 %v936_v52, %v459_v21  ;;  %v480_v61 = vadd.f32 %v936_v52, %v460_v59  ;;  %v481_v62 = vadd.f32 %v936_v52, %v461_v23  ;;  %v463_v56 = vmul.f32 %v914_v22, %v443_v28 }
 0x116   : > { %vm493_vm11 = vcmp.ge.f32.partialorder %v477_v0, 0.0  ;;  %v509_v60 = vmul.f32 0.2, %v477_v0  ;;  %vm494_vm12 = vcmp.ge.f32.partialorder %v478_v32, 0.0  ;;  %v510_v63 = vmul.f32 0.2, %v478_v32 }
 0x117   : > { %vm495_vm13 = vcmp.ge.f32.partialorder %v479_v4, 0.0  ;;  %v511_v8 = vmul.f32 0.2, %v479_v4  ;;  %vm496_vm14 = vcmp.ge.f32.partialorder %v480_v61, 0.0  ;;  %v512_v35 = vmul.f32 0.2, %v480_v61 }
 0x118   : > { %v525_v40 = vsel %vm493_vm11, %v477_v0, %v509_v60  ;;  %v526_v48 = vsel %vm494_vm12, %v478_v32, %v510_v63  ;;  %vm497_vm15 = vcmp.ge.f32.partialorder %v481_v62, 0.0  ;;  %v513_v1 = vmul.f32 0.2, %v481_v62 }
 0x119   : > { %541 = vst [vmem:[%s1049_s4 + $0x40] sm:$0xff] %v525_v40  ;;  %v527_v2 = vsel %vm495_vm13, %v479_v4, %v511_v8  ;;  %v528_v3 = vsel %vm496_vm14, %v480_v61, %v512_v35  ;;  %v482_v5 = vadd.f32 %v936_v52, %v462_v36  ;;  %v483_v6 = vadd.f32 %v936_v52, %v463_v56 }
 0x11a   : > { %542 = vst [vmem:[%s1049_s4 + $0x48] sm:$0xff] %v526_v48  ;;  %v529_v7 = vsel %vm497_vm15, %v481_v62, %v513_v1  ;;  %v464_v9 = vmul.f32 %v914_v22, %v444_v44 }
 0x11b   : > { %543 = vst [vmem:[%s1049_s4 + $0x50] sm:$0xff] %v527_v2  ;;  %vm498_vm0 = vcmp.ge.f32.partialorder %v482_v5, 0.0  ;;  %v514_v10 = vmul.f32 0.2, %v482_v5  ;;  %vm499_vm1 = vcmp.ge.f32.partialorder %v483_v6, 0.0 }
 0x11c   : > { %544 = vst [vmem:[%s1049_s4 + $0x58] sm:$0xff] %v528_v3  ;;  %v515_v11 = vmul.f32 0.2, %v483_v6  ;;  %v484_v12 = vadd.f32 %v936_v52, %v464_v9 }
 0x11d   : > { %545 = vst [vmem:[%s1049_s4 + $0x60] sm:$0xff] %v529_v7  ;;  %v530_v13 = vsel %vm498_vm0, %v482_v5, %v514_v10 }
 0x11e   : > { %546 = vst [vmem:[%s1049_s4 + $0x68] sm:$0xff] %v530_v13  ;;  %v531_v22 = vsel %vm499_vm1, %v483_v6, %v515_v11  ;;  %vm500_vm2 = vcmp.ge.f32.partialorder %v484_v12, 0.0  ;;  %v516_v14 = vmul.f32 0.2, %v484_v12 }
 0x11f   : > { %547 = vst [vmem:[%s1049_s4 + $0x70] sm:$0xff] %v531_v22 }
 0x120   : > { %v532_v15 = vsel %vm500_vm2, %v484_v12, %v516_v14 }
 0x121   : > { %548 = vst [vmem:[%s1049_s4 + $0x78] sm:$0xff] %v532_v15 }
 0x122 PF: > { %s14_s15 = sadd.s32 1, %s691_s15  }
 0x123   : > { %p11_p5 = scmp.ge.s32.totalorder %s14_s15, 4  }
 0x125   :  { %13 = sbr.rel (!%p11_p5) target bundleno = 1 (0x1), region = 67 }

// kernel: discriminator_forward.5
= control target key start
LH: loop header
LB: loop body
LE: loop exit
PB: predicated region body
PF: predicated region fallthrough
CT: control target
= control target key end

     0   :  { %vm312_vm7 = vcmask 261120   ;;  %vm336_vm8 = vcmask 1041408   ;;  %vm361_vm12 = vcmask 1024   ;;  %s632_s1 = inlined_call_operand.vmem [shape: bf16[256,128], index: 1, kind: input, shape index: {}]   ;;  %s633_s0 = inlined_call_operand.vmem [shape: bf16[32,256], index: 0, kind: input, shape index: {}]   ;;  %s634_s2 = inlined_call_operand.vmem [shape: f32[1,128], index: 2, kind: input, shape index: {}]   ;;  %s635_s3 = inlined_call_operand.vmem [shape: f32[1,128], index: 3, kind: input, shape index: {}]   ;;  %s636_s4 = inlined_call_operand.vmem [shape: f32[32,128], index: 4, kind: input, shape index: {}]   ;;  %s637_s5 = inlined_call_operand.vmem [shape: f32[2,32], index: 5, kind: input, shape index: {}]   ;;  %s638_s6 = inlined_call_operand.vmem [shape: f32[2,1], index: 6, kind: input, shape index: {}]   ;;  %s639_s7 = inlined_call_operand.vmem [shape: f32[2,1], index: 7, kind: output, shape index: {}]  }
   0x1   :  { %v460_v0 = vld [vmem:[%s632_s1 + $0x38] sm:$0xff]  ;;  %v459_v2 = vld [vmem:[%s632_s1 + $0x30] sm:$0xff]  ;;  %v458_v4 = vld [vmem:[%s632_s1 + $0x28] sm:$0xff] }
   0x2   :  { %v468_v1 = vld [vmem:[%s632_s1 + $0x78] sm:$0xff]  ;;  %179 = vmatpush.bf16.msra.mxu0 %v460_v0  ;;  %469 = vmatpush.bf16.msra.mxu3 %v460_v0  ;;  %v467_v3 = vld [vmem:[%s632_s1 + $0x70] sm:$0xff]  ;;  %v466_v5 = vld [vmem:[%s632_s1 + $0x68] sm:$0xff] }
   0x3   :  { %198 = vmatpush.bf16.msra.mxu1 %v468_v1  ;;  %477 = vmatpush.bf16.msra.mxu2 %v468_v1  ;;  %v457_v6 = vld [vmem:[%s632_s1 + $0x20] sm:$0xff]  ;;  %v456_v8 = vld [vmem:[%s632_s1 + $0x18] sm:$0xff]  ;;  %v455_v10 = vld [vmem:[%s632_s1 + $0x10] sm:$0xff] }
   0x4   :  { %v465_v7 = vld [vmem:[%s632_s1 + $0x60] sm:$0xff]  ;;  %v464_v9 = vld [vmem:[%s632_s1 + $0x58] sm:$0xff]  ;;  %v463_v11 = vld [vmem:[%s632_s1 + $0x50] sm:$0xff] }
   0x5   :  { %v454_v12 = vld [vmem:[%s632_s1 + $0x8] sm:$0xff]  ;;  %v453_v14 = vld [vmem:[%s632_s1] sm:$0xff]  ;;  %v377_v18 = vld [vmem:[%s633_s0 + $0x10] sm:$0xf] }
   0x6   :  { %180 = vmatpush.bf16.msra.mxu0 %v459_v2  ;;  %470 = vmatpush.bf16.msra.mxu3 %v459_v2  ;;  %v462_v13 = vld [vmem:[%s632_s1 + $0x48] sm:$0xff]  ;;  %v461_v15 = vld [vmem:[%s632_s1 + $0x40] sm:$0xff]  ;;  %v452_v19 = vld [vmem:[%s633_s0 + $0x14] sm:$0xf0] }
   0x7   :  { %199 = vmatpush.bf16.msra.mxu1 %v467_v3  ;;  %478 = vmatpush.bf16.msra.mxu2 %v467_v3  ;;  %v369_v16 = vld [vmem:[%s633_s0] sm:$0xf]  ;;  %v450_v17 = vld [vmem:[%s633_s0 + $0x4] sm:$0xf0]  ;;  %v449_v20 = vld [vmem:[%s633_s0 + $0x4] sm:$0xf]  ;;  %v378_v25 = vor.u32 %v452_v19, %v377_v18 }
   0x8   :  { %v371_v21 = vld [vmem:[%s633_s0 + $0x8] sm:$0xf0]  ;;  %v451_v22 = vld [vmem:[%s633_s0 + $0x14] sm:$0xf]  ;;  %v379_v23 = vld [vmem:[%s633_s0 + $0x18] sm:$0xf0]  ;;  %v370_v24 = vor.u32 %v450_v17, %v369_v16 }
   0x9   :  { %v374_v26 = vor.u32 %v449_v20, %v371_v21  ;;  %v382_v27 = vor.u32 %v451_v22, %v379_v23  ;;  %v486_v16 = vld [vmem:[%s635_s3] ss:$0 sm:$0xff] }
   0xa   :  { %181 = vmatpush.bf16.msra.mxu0 %v458_v4  ;;  %471 = vmatpush.bf16.msra.mxu3 %v458_v4 }
   0xb   :  { %200 = vmatpush.bf16.msra.mxu1 %v466_v5  ;;  %479 = vmatpush.bf16.msra.mxu2 %v466_v5 }
   0xe   :  { %182 = vmatpush.bf16.msra.mxu0 %v457_v6  ;;  %472 = vmatpush.bf16.msra.mxu3 %v457_v6 }
   0xf   :  { %201 = vmatpush.bf16.msra.mxu1 %v465_v7  ;;  %480 = vmatpush.bf16.msra.mxu2 %v465_v7 }
  0x12   :  { %183 = vmatpush.bf16.msra.mxu0 %v456_v8  ;;  %473 = vmatpush.bf16.msra.mxu3 %v456_v8 }
  0x13   :  { %202 = vmatpush.bf16.msra.mxu1 %v464_v9  ;;  %481 = vmatpush.bf16.msra.mxu2 %v464_v9 }
  0x16   :  { %184 = vmatpush.bf16.msra.mxu0 %v455_v10  ;;  %474 = vmatpush.bf16.msra.mxu3 %v455_v10  ;;  %v485_v10 = vld [vmem:[%s634_s2] ss:$0 sm:$0xff] }
  0x17   :  { %203 = vmatpush.bf16.msra.mxu1 %v463_v11  ;;  %482 = vmatpush.bf16.msra.mxu2 %v463_v11 }
  0x1a   :  { %185 = vmatpush.bf16.msra.mxu0 %v454_v12  ;;  %475 = vmatpush.bf16.msra.mxu3 %v454_v12 }
  0x1b   :  { %204 = vmatpush.bf16.msra.mxu1 %v462_v13  ;;  %483 = vmatpush.bf16.msra.mxu2 %v462_v13 }
  0x1e   :  { %186 = vmatpush.bf16.msra.mxu0 %v453_v14  ;;  %476 = vmatpush.bf16.msra.mxu3 %v453_v14 }
  0x1f   :  { %205 = vmatpush.bf16.msra.mxu1 %v461_v15  ;;  %484 = vmatpush.bf16.msra.mxu2 %v461_v15 }
  0x21   :  { %187 = vmatmul.bf16.vlgmr.msra.gmra.mxu0 %v370_v24  ;;  %192 = vmatmul.bf16.vlgmr.msra.gmra.mxu3 %v378_v25 }
  0x22   :  { %206 = vmatmul.bf16.vlgmr.msra.gmra.mxu1 %v374_v26  ;;  %211 = vmatmul.bf16.vlgmr.msra.gmra.mxu2 %v382_v27 }
  0x9e   :  { %v188_v28 = vpop.f32.mrf.mxu0 }
  0x9f   :  { %v207_v29 = vpop.f32.mrf.mxu1 }
  0xa0   :  { %v208_v32 = vadd.f32 %v207_v29, %v188_v28  ;;  %v306_v28 = vld [vmem:[%s636_s4 + $0x18] sm:$0xff] }
  0xa2   :  { %v240_v36 = vmul.f32 %v208_v32, %v208_v32 }
  0xa4   :  { %v193_v30 = vpop.f32.mrf.mxu3 }
  0xa5   :  { %v212_v31 = vpop.f32.mrf.mxu2 }
  0xa6   :  { %v190_v33 = vpop.f32.mrf.mxu0  ;;  %v213_v37 = vadd.f32 %v212_v31, %v193_v30 }
  0xa7   :  { %v209_v34 = vpop.f32.mrf.mxu1 }
  0xa8   :  { %v210_v35 = vadd.f32 %v209_v34, %v190_v33  ;;  %v242_v43 = vmul.f32 %v213_v37, %v213_v37  ;;  %v305_v34 = vld [vmem:[%s636_s4 + $0x10] sm:$0xff] }
  0xaa   :  { %v230_v38 = vadd.f32 %v210_v35, %v208_v32  ;;  %v241_v39 = vmul.f32 %v210_v35, %v210_v35 }
  0xac   :  { %v244_v40 = vadd.f32 %v241_v39, %v240_v36  ;;  %v195_v41 = vpop.f32.mrf.mxu3  ;;  %v231_v45 = vadd.f32 %v230_v38, %v213_v37  ;;  %v304_v38 = vld [vmem:[%s636_s4 + $0x8] sm:$0xff] }
  0xad   :  { %v214_v42 = vpop.f32.mrf.mxu2 }
  0xae   :  { %v215_v44 = vadd.f32 %v214_v42, %v195_v41  ;;  %v245_v48 = vadd.f32 %v244_v40, %v242_v43  ;;  %v303_v41 = vld [vmem:[%s636_s4] sm:$0xff] }
  0xb0   :  { %v232_v46 = vadd.f32 %v231_v45, %v215_v44  ;;  %v243_v47 = vmul.f32 %v215_v44, %v215_v44 }
  0xb2   :  { %v233_v49 = vrot.slane %v232_v46, 4  ;;  %v246_v50 = vadd.f32 %v245_v48, %v243_v47  ;;  %v340_v47 = vld [vmem:[%s638_s6] sm:$0x3] }
  0xb4   :  { %v234_v51 = vadd.f32 %v233_v49, %v232_v46  ;;  %v247_v52 = vrot.slane %v246_v50, 4 }
  0xb6   :  { %v235_v53 = vrot.slane %v234_v51, 2  ;;  %v248_v54 = vadd.f32 %v247_v52, %v246_v50 }
  0xb8   :  { %v236_v55 = vadd.f32 %v235_v53, %v234_v51  ;;  %v249_v56 = vrot.slane %v248_v54, 2 }
  0xba   :  { %v237_v57 = vrot.slane %v236_v55, 1  ;;  %v250_v58 = vadd.f32 %v249_v56, %v248_v54 }
  0xbc   :  { %v238_v59 = vadd.f32 %v237_v57, %v236_v55  ;;  %v251_v60 = vrot.slane %v250_v58, 1 }
  0xbe   :  { %v239_v61 = vmul.f32 0.03125, %v238_v59  ;;  %v252_v62 = vadd.f32 %v251_v60, %v250_v58 }
  0xc0   :  { %v253_v63 = vmul.f32 0.03125, %v252_v62  ;;  %v254_v0 = vmul.f32 %v239_v61, %v239_v61  ;;  %v259_v9 = vsub.f32 %v215_v44, %v239_v61  ;;  %v258_v11 = vsub.f32 %v213_v37, %v239_v61  ;;  %v311_v44 = vld [vmem:[%s637_s5] sm:$0x3] }
  0xc1   :  { %v257_v12 = vsub.f32 %v210_v35, %v239_v61  ;;  %v256_v13 = vsub.f32 %v208_v32, %v239_v61 }
  0xc2   :  { %v255_v1 = vsub.f32 %v253_v63, %v254_v0 }
  0xc4   :  { %v260_v2 = vadd.f32 1e-05, %v255_v1 }
  0xc6   :  { %487 = vrsqrt.f32 %v260_v2  ;;  %vm267_vm1 = vweird.f32 %v260_v2 }
  0xcc   :  { %v488_v3 = vpop.eup %487 }
  0xcd   :  { %v262_v4 = vmul.f32 %v488_v3, %v260_v2  ;;  %vm268_vm0 = vweird.f32 %v488_v3 }
  0xce   :  { %vm269_vm2 = vmor %vm267_vm1, %vm268_vm0 }
  0xcf   :  { %v263_v5 = vmul.f32 %v488_v3, %v262_v4 }
  0xd1   :  { %v264_v6 = vmul.f32 0.5, %v263_v5 }
  0xd3   :  { %v265_v7 = vsub.f32 1.5, %v264_v6 }
  0xd5   :  { %v266_v8 = vmul.f32 %v488_v3, %v265_v7 }
  0xd7   :  { %v270_v14 = vsel %vm269_vm2, %v488_v3, %v266_v8 }
  0xd8   :  { %v274_v15 = vmul.f32 %v270_v14, %v259_v9  ;;  %v273_v17 = vmul.f32 %v270_v14, %v258_v11  ;;  %v272_v18 = vmul.f32 %v270_v14, %v257_v12  ;;  %v271_v19 = vmul.f32 %v270_v14, %v256_v13 }
  0xda   :  { %v282_v20 = vmul.f32 %v485_v10, %v274_v15  ;;  %v281_v21 = vmul.f32 %v485_v10, %v273_v17  ;;  %v280_v22 = vmul.f32 %v485_v10, %v272_v18  ;;  %v279_v23 = vmul.f32 %v485_v10, %v271_v19 }
  0xdc   :  { %v290_v24 = vadd.f32 %v486_v16, %v282_v20  ;;  %v289_v25 = vadd.f32 %v486_v16, %v281_v21  ;;  %v288_v26 = vadd.f32 %v486_v16, %v280_v22  ;;  %v287_v27 = vadd.f32 %v486_v16, %v279_v23 }
  0xde   :  { %vm294_vm3 = vcmp.ge.f32.partialorder %v290_v24, 0.0  ;;  %v298_v29 = vmul.f32 0.2, %v290_v24  ;;  %vm293_vm4 = vcmp.ge.f32.partialorder %v289_v25, 0.0  ;;  %v297_v30 = vmul.f32 0.2, %v289_v25 }
  0xdf   :  { %vm292_vm5 = vcmp.ge.f32.partialorder %v288_v26, 0.0  ;;  %v296_v31 = vmul.f32 0.2, %v288_v26  ;;  %v295_v35 = vmul.f32 0.2, %v287_v27  ;;  %vm291_vm6 = vcmp.ge.f32.partialorder %v287_v27, 0.0 }
  0xe0   :  { %v302_v32 = vsel %vm294_vm3, %v290_v24, %v298_v29  ;;  %v301_v33 = vsel %vm293_vm4, %v289_v25, %v297_v30 }
  0xe1   :  { %v310_v36 = vmul.f32 %v306_v28, %v302_v32  ;;  %v300_v37 = vsel %vm292_vm5, %v288_v26, %v296_v31  ;;  %v309_v39 = vmul.f32 %v305_v34, %v301_v33  ;;  %v299_v40 = vsel %vm291_vm6, %v287_v27, %v295_v35 }
  0xe2   :  { %v308_v42 = vmul.f32 %v304_v38, %v300_v37  ;;  %v307_v43 = vmul.f32 %v303_v41, %v299_v40 }
  0xe3   :  { %328 = vmatpush.msrb.mxu2 %v310_v36 }
  0xe5   :  { %329 = vmatpush.msrb.mxu2 %v309_v39 }
  0xe7   :  { %330 = vmatpush.msrb.mxu2 %v308_v42 }
  0xe9   :  { %331 = vmatpush.msrb.mxu2 %v307_v43 }
  0xea   :  { %447 = vmatmul.msk.f32.vlgmr.msrb.gmra.mxu2 %vm312_vm7, %v311_v44 }
 0x16d   :  { %v333_v45 = vpop.f32.mrf.mxu2 }
 0x16e   :  { %v337_v46 = vsel %vm336_vm8, %v333_v45, 0.0 }
 0x16f   :  { %338 = vadd.xlane.f32.xlu0 %v337_v46 }
 0x1e2   :  { %v339_v48 = vpop.xlane.xlu0 %338 }
 0x1e3   :  { %v341_v49 = vadd.f32 %v340_v47, %v339_v48 }
 0x1e5   :  { %v448_v50 = vmul.f32 -1.442695, %v341_v49 }
 0x1e7   :  { %489 = vpow2.f32 %v448_v50 }
 0x1ed   :  { %v490_v51 = vpop.eup %489 }
 0x1ee   :  { %v345_v52 = vadd.f32 1.0, %v490_v51 }
 0x1f0   :  { %491 = vrcp.f32 %v345_v52  ;;  %v357_v56 = vand.u32 2147483648, %v345_v52  ;;  %v355_v58 = vand.u32 2147483647, %v345_v52  ;;  %vm351_vm10 = vweird.f32 %v345_v52 }
 0x1f2   :  { %v358_v60 = vor.u32 1.1754944e-38, %v357_v56  ;;  %vm356_vm13 = vcmp.eq.f32.partialorder %v355_v58, 8.507059e+37 }
 0x1f6   :  { %v492_v53 = vpop.eup %491 }
 0x1f7   :  { %v347_v54 = vmul.f32 %v492_v53, %v345_v52  ;;  %vm352_vm9 = vweird.f32 %v492_v53 }
 0x1f8   :  { %vm353_vm11 = vmor %vm351_vm10, %vm352_vm9 }
 0x1f9   :  { %v348_v55 = vsub.f32 1.0, %v347_v54 }
 0x1fb   :  { %v349_v57 = vmul.f32 %v492_v53, %v348_v55 }
 0x1fd   :  { %v350_v59 = vadd.f32 %v492_v53, %v349_v57 }
 0x1ff   :  { %v354_v61 = vsel %vm353_vm11, %v492_v53, %v350_v59 }
 0x200   :  { %v359_v62 = vsel %vm356_vm13, %v358_v60, %v354_v61 }
 0x201   :  { %362 = vst.msk [vmem:[%s639_s7] sm:$0x3] %vm361_vm12, %v359_v62 }

</bundles_post_ra>
